<compile_context>
chip_gen: v7x
topology: tpu7x:2x2x1
jax: 0.10.0
libtpu: 0.0.40
codegen_flags: <defaults>
</compile_context>

<pallas_src>
import jax
import jax.numpy as jnp
from jax import lax
from jax.experimental import pallas as pl
from jax.experimental.pallas import tpu as pltpu

HIDDEN = 128
BN_EPS = 1e-5

# Rows of the packed (8, 128) vector slab.
ROW_BIN, ROW_BFC, ROW_GAMMA, ROW_BETA, ROW_WOUT, ROW_BOUT = 0, 1, 2, 3, 4, 5


def cnet_kernel(s_ref, a_ref, ws_ref, wa_ref, wfc_ref, vec_ref, o_ref):
    # One aligned (8,128) load for all per-channel vectors.
    vecs = vec_ref[...]
    b_in  = vecs[ROW_BIN:ROW_BIN + 1, :]      # (1,128) fused bs + ba
    b_fc  = vecs[ROW_BFC:ROW_BFC + 1, :]      # (1,128)
    gamma = vecs[ROW_GAMMA:ROW_GAMMA + 1, :]  # (1,128)
    beta  = vecs[ROW_BETA:ROW_BETA + 1, :]    # (1,128)
    w_out = vecs[ROW_WOUT:ROW_WOUT + 1, :]    # (1,128) out-layer weight row
    b_out = vecs[ROW_BOUT:ROW_BOUT + 1, 0:1]  # (1,1)   out-layer bias

    # Input projections: relu(s @ Ws + a @ Wa + (bs + ba)).
    net = (jnp.dot(s_ref[...], ws_ref[...], preferred_element_type=jnp.float32)
           + jnp.dot(a_ref[...], wa_ref[...], preferred_element_type=jnp.float32)
           + b_in)
    net = jnp.maximum(net, 0.0)

    # Hidden layer: net @ Wfc + bfc.  (bfc is mathematically cancelled by the
    # batch-mean subtraction below, but kept for exact semantic fidelity.)
    net = jnp.dot(net, wfc_ref[...], preferred_element_type=jnp.float32) + b_fc

    # BatchNorm1d, training mode (biased batch stats), single pass over net.
    inv_b = 1.0 / net.shape[0]
    s1 = jnp.sum(net, axis=0, keepdims=True)
    s2 = jnp.sum(net * net, axis=0, keepdims=True)
    mean = s1 * inv_b
    var = jnp.maximum(s2 * inv_b - mean * mean, 0.0)
    inv_std = lax.rsqrt(var + BN_EPS)                 # EUP

    # Fold BN affine + output head into a single effective row / scalar:
    #   out = sum_c( net * scale * wout ) + sum_c( shift * wout ) + bout
    scale = gamma * inv_std                           # (1,128)
    shift = beta - mean * scale                       # (1,128)
    w_eff = scale * w_out                             # (1,128)
    b_eff = jnp.sum(shift * w_out, axis=-1, keepdims=True) + b_out   # (1,1)

    # Output head: VPU multiply + XLU lane reduce (no N=1 MXU pass, no
    # materialized normalized activation).
    o_ref[...] = jnp.sum(net * w_eff, axis=-1, keepdims=True) + b_eff


def pack_params(p):
    """Pack raw CNet parameters into kernel-friendly device arrays (do once)."""
    vec = jnp.zeros((8, HIDDEN), jnp.float32)
    vec = vec.at[ROW_BIN].set((p["bs"] + p["ba"]).reshape(HIDDEN))
    vec = vec.at[ROW_BFC].set(p["bfc"].reshape(HIDDEN))
    vec = vec.at[ROW_GAMMA].set(p["gamma"].reshape(HIDDEN))
    vec = vec.at[ROW_BETA].set(p["beta"].reshape(HIDDEN))
    vec = vec.at[ROW_WOUT].set(p["wout"].reshape(HIDDEN))
    vec = vec.at[ROW_BOUT, 0].set(p["bout"].reshape(()))
    return {"ws": p["ws"], "wa": p["wa"], "wfc": p["wfc"], "vec": vec}


@jax.jit
def cnet_forward(s, a, packed):
    B = s.shape[0]
    vmem = pl.BlockSpec(memory_space=pltpu.MemorySpace.VMEM)
    return pl.pallas_call(
        cnet_kernel,
        out_shape=jax.ShapeDtypeStruct((B, 1), jnp.float32),
        in_specs=[vmem] * 6,
        out_specs=vmem,
    )(s, a, packed["ws"], packed["wa"], packed["wfc"], packed["vec"])


def init_params(key, s_dim, a_dim):
    """Synthetic init mimicking CNet.__init__ shapes.

    PyTorch Linear weight (out, in) is stored pre-transposed as (in, out) so
    the kernel does plain x @ W.  gamma/beta are perturbed from the PyTorch
    defaults (1, 0) so the BN-affine path is actually exercised by the test.
    """
    ks = jax.random.split(key, 10)
    std = 0.1
    return {
        "ws":    jax.random.normal(ks[0], (s_dim, HIDDEN), jnp.float32) * std,
        "bs":    jax.random.normal(ks[1], (1, HIDDEN), jnp.float32) * std,
        "wa":    jax.random.normal(ks[2], (a_dim, HIDDEN), jnp.float32) * std,
        "ba":    jax.random.normal(ks[3], (1, HIDDEN), jnp.float32) * std,
        "wfc":   jax.random.normal(ks[4], (HIDDEN, HIDDEN), jnp.float32) * std,
        "bfc":   jax.random.normal(ks[5], (1, HIDDEN), jnp.float32) * std,
        "gamma": 1.0 + jax.random.normal(ks[6], (1, HIDDEN), jnp.float32) * std,
        "beta":  jax.random.normal(ks[7], (1, HIDDEN), jnp.float32) * std,
        "wout":  jax.random.normal(ks[8], (HIDDEN, 1), jnp.float32) * std,
        "bout":  jax.random.normal(ks[9], (1, 1), jnp.float32) * std,
    }


def reference_forward(s, a, p):
    """Plain-JAX reference of the PyTorch forward (training-mode BN)."""
    x = s @ p["ws"] + p["bs"]
    y = a @ p["wa"] + p["ba"]
    net = jnp.maximum(x + y, 0.0)
    net = net @ p["wfc"] + p["bfc"]
    mean = jnp.mean(net, axis=0, keepdims=True)
    var = jnp.mean((net - mean) ** 2, axis=0, keepdims=True)
    net = (net - mean) / jnp.sqrt(var + BN_EPS) * p["gamma"] + p["beta"]
    return net @ p["wout"] + p["bout"]


if __name__ == "__main__":
    B, S_DIM, A_DIM = 8, 16, 8

    key = jax.random.PRNGKey(0)
    k_s, k_a, k_p = jax.random.split(key, 3)

    s = jax.random.normal(k_s, (B, S_DIM), jnp.float32)
    a = jax.random.normal(k_a, (B, A_DIM), jnp.float32)
    params = init_params(k_p, S_DIM, A_DIM)
    packed = pack_params(params)   # pack weights once; reuse across calls

    out = cnet_forward(s, a, packed)
    out = jax.block_until_ready(out)

    ref = reference_forward(s, a, params)
    assert out.shape == (B, 1)
    assert jnp.allclose(out, ref, atol=1e-4, rtol=1e-4), "mismatch vs reference"

    print("KERNEL_OK")
</pallas_src>

<mosaic_0001>
module attributes {stable_mosaic.version = 11 : i64} {
  func.func @cnet_kernel(%arg0: memref<8x16xf32, #tpu.memory_space<vmem>>, %arg1: memref<8x8xf32, #tpu.memory_space<vmem>>, %arg2: memref<16x128xf32, #tpu.memory_space<vmem>>, %arg3: memref<8x128xf32, #tpu.memory_space<vmem>>, %arg4: memref<128x128xf32, #tpu.memory_space<vmem>>, %arg5: memref<8x128xf32, #tpu.memory_space<vmem>>, %arg6: memref<8x1xf32, #tpu.memory_space<vmem>>) attributes {dimension_semantics = [], scalar_prefetch = 0 : i64, scratch_operands = 0 : i64, tpu.core_type = #tpu.core_type<tc>} {
    %c0 = arith.constant 0 : index
    %c0_0 = arith.constant 0 : index
    %0 = vector.load %arg5[%c0, %c0_0] : memref<8x128xf32, #tpu.memory_space<vmem>>, vector<8x128xf32>
    %1 = vector.extract_strided_slice %0 {offsets = [0, 0], sizes = [1, 128], strides = [1, 1]} : vector<8x128xf32> to vector<1x128xf32>
    %2 = vector.extract_strided_slice %0 {offsets = [1, 0], sizes = [1, 128], strides = [1, 1]} : vector<8x128xf32> to vector<1x128xf32>
    %3 = vector.extract_strided_slice %0 {offsets = [2, 0], sizes = [1, 128], strides = [1, 1]} : vector<8x128xf32> to vector<1x128xf32>
    %4 = vector.extract_strided_slice %0 {offsets = [3, 0], sizes = [1, 128], strides = [1, 1]} : vector<8x128xf32> to vector<1x128xf32>
    %5 = vector.extract_strided_slice %0 {offsets = [4, 0], sizes = [1, 128], strides = [1, 1]} : vector<8x128xf32> to vector<1x128xf32>
    %6 = vector.extract_strided_slice %0 {offsets = [5, 0], sizes = [1, 1], strides = [1, 1]} : vector<8x128xf32> to vector<1x1xf32>
    %c0_1 = arith.constant 0 : index
    %c0_2 = arith.constant 0 : index
    %7 = vector.load %arg0[%c0_1, %c0_2] : memref<8x16xf32, #tpu.memory_space<vmem>>, vector<8x16xf32>
    %c0_3 = arith.constant 0 : index
    %c0_4 = arith.constant 0 : index
    %8 = vector.load %arg2[%c0_3, %c0_4] : memref<16x128xf32, #tpu.memory_space<vmem>>, vector<16x128xf32>
    %cst = arith.constant dense<0.000000e+00> : vector<8x128xf32>
    %9 = tpu.matmul %7, %8, %cst {dimension_numbers = #tpu.dot_dimension_numbers<[1], [0], [0], [1], [0, 0, 1, 1], [], []>} : vector<8x16xf32>, vector<16x128xf32>, vector<8x128xf32> -> vector<8x128xf32>
    %c0_5 = arith.constant 0 : index
    %c0_6 = arith.constant 0 : index
    %10 = vector.load %arg1[%c0_5, %c0_6] : memref<8x8xf32, #tpu.memory_space<vmem>>, vector<8x8xf32>
    %c0_7 = arith.constant 0 : index
    %c0_8 = arith.constant 0 : index
    %11 = vector.load %arg3[%c0_7, %c0_8] : memref<8x128xf32, #tpu.memory_space<vmem>>, vector<8x128xf32>
    %cst_9 = arith.constant dense<0.000000e+00> : vector<8x128xf32>
    %12 = tpu.matmul %10, %11, %cst_9 {dimension_numbers = #tpu.dot_dimension_numbers<[1], [0], [0], [1], [0, 0, 1, 1], [], []>} : vector<8x8xf32>, vector<8x128xf32>, vector<8x128xf32> -> vector<8x128xf32>
    %13 = arith.addf %9, %12 : vector<8x128xf32>
    %14 = vector.broadcast %1 : vector<1x128xf32> to vector<8x128xf32>
    %15 = arith.addf %13, %14 : vector<8x128xf32>
    %cst_10 = arith.constant 0.000000e+00 : f32
    %16 = vector.broadcast %cst_10 : f32 to vector<8x128xf32>
    %17 = arith.maximumf %15, %16 : vector<8x128xf32>
    %c0_11 = arith.constant 0 : index
    %c0_12 = arith.constant 0 : index
    %18 = vector.load %arg4[%c0_11, %c0_12] : memref<128x128xf32, #tpu.memory_space<vmem>>, vector<128x128xf32>
    %cst_13 = arith.constant dense<0.000000e+00> : vector<8x128xf32>
    %19 = tpu.matmul %17, %18, %cst_13 {dimension_numbers = #tpu.dot_dimension_numbers<[1], [0], [0], [1], [0, 0, 1, 1], [], []>} : vector<8x128xf32>, vector<128x128xf32>, vector<8x128xf32> -> vector<8x128xf32>
    %20 = vector.broadcast %2 : vector<1x128xf32> to vector<8x128xf32>
    %21 = arith.addf %19, %20 : vector<8x128xf32>
    %cst_14 = arith.constant dense<0.000000e+00> : vector<128xf32>
    %22 = vector.multi_reduction <add>, %21, %cst_14 [0] : vector<8x128xf32> to vector<128xf32>
    %23 = vector.shape_cast %22 : vector<128xf32> to vector<1x128xf32>
    %24 = arith.mulf %21, %21 : vector<8x128xf32>
    %cst_15 = arith.constant dense<0.000000e+00> : vector<128xf32>
    %25 = vector.multi_reduction <add>, %24, %cst_15 [0] : vector<8x128xf32> to vector<128xf32>
    %26 = vector.shape_cast %25 : vector<128xf32> to vector<1x128xf32>
    %cst_16 = arith.constant 1.250000e-01 : f32
    %27 = vector.broadcast %cst_16 : f32 to vector<1x128xf32>
    %28 = arith.mulf %23, %27 : vector<1x128xf32>
    %cst_17 = arith.constant 1.250000e-01 : f32
    %29 = vector.broadcast %cst_17 : f32 to vector<1x128xf32>
    %30 = arith.mulf %26, %29 : vector<1x128xf32>
    %31 = arith.mulf %28, %28 : vector<1x128xf32>
    %32 = arith.subf %30, %31 : vector<1x128xf32>
    %cst_18 = arith.constant 0.000000e+00 : f32
    %33 = vector.broadcast %cst_18 : f32 to vector<1x128xf32>
    %34 = arith.maximumf %32, %33 : vector<1x128xf32>
    %cst_19 = arith.constant 9.99999974E-6 : f32
    %35 = vector.broadcast %cst_19 : f32 to vector<1x128xf32>
    %36 = arith.addf %34, %35 : vector<1x128xf32>
    %37 = math.rsqrt %36 : vector<1x128xf32>
    %38 = arith.mulf %3, %37 : vector<1x128xf32>
    %39 = arith.mulf %28, %38 : vector<1x128xf32>
    %40 = arith.subf %4, %39 : vector<1x128xf32>
    %41 = arith.mulf %38, %5 : vector<1x128xf32>
    %42 = arith.mulf %40, %5 : vector<1x128xf32>
    %cst_20 = arith.constant dense<0.000000e+00> : vector<1xf32>
    %43 = vector.multi_reduction <add>, %42, %cst_20 [1] : vector<1x128xf32> to vector<1xf32>
    %44 = vector.shape_cast %43 : vector<1xf32> to vector<1x1xf32>
    %45 = arith.addf %44, %6 : vector<1x1xf32>
    %46 = vector.broadcast %41 : vector<1x128xf32> to vector<8x128xf32>
    %47 = arith.mulf %21, %46 : vector<8x128xf32>
    %cst_21 = arith.constant dense<0.000000e+00> : vector<8xf32>
    %48 = vector.multi_reduction <add>, %47, %cst_21 [1] : vector<8x128xf32> to vector<8xf32>
    %49 = vector.shape_cast %48 : vector<8xf32> to vector<8x1xf32>
    %50 = vector.broadcast %45 : vector<1x1xf32> to vector<8x1xf32>
    %51 = arith.addf %49, %50 : vector<8x1xf32>
    %c0_22 = arith.constant 0 : index
    %c0_23 = arith.constant 0 : index
    %52 = vector.load %arg6[%c0_22, %c0_23] : memref<8x1xf32, #tpu.memory_space<vmem>>, vector<8x1xf32>
    tpu.vector_store %arg6[%c0_22, %c0_23], %51 {strides = array<i32>} : memref<8x1xf32, #tpu.memory_space<vmem>>, vector<8x1xf32>,
    return
  }
}

</mosaic_0001>

<bundles_post_ra>
// kernel: cnet_forward.1
= control target key start
LH: loop header
LB: loop body
LE: loop exit
PB: predicated region body
PF: predicated region fallthrough
CT: control target
= control target key end

     0   :  { %11 = vsyncpa [#allocation3], 0  ;;  %s742_s0 = inlined_call_operand.hbm [shape: f32[8,16], index: 0, kind: input, shape index: {}]   ;;  %s743_s1 = inlined_call_operand.hbm [shape: f32[8,8], index: 1, kind: input, shape index: {}]   ;;  %s744_s2 = inlined_call_operand.vmem [shape: f32[16,128], index: 2, kind: input, shape index: {}]   ;;  %s745_s3 = inlined_call_operand.hbm [shape: f32[8,128], index: 3, kind: input, shape index: {}]   ;;  %s746_s4 = inlined_call_operand.hbm [shape: f32[128,128], index: 4, kind: input, shape index: {}]   ;;  %s747_s5 = inlined_call_operand.hbm [shape: f32[8,128], index: 5, kind: input, shape index: {}]   ;;  %s748_s6 = inlined_call_operand.vmem [shape: f32[8,1], index: 6, kind: output, shape index: {}]  }
   0x1   :  { %12 = vsyncpa [#allocation5], 0 }
   0x2   :  { %13 = vsyncpa [#allocation8], 0  ;;  %s618_s21 = smov [#allocation4]   ;;  %s619_s23 = smov [#allocation7]  }
   0x3   :  { %s30_s22 = sshll.u32 %s618_s21, 4  ;;  %s51_s24 = sshll.u32 %s619_s23, 4  ;;  %s31_s22 = int_to_ptr.vmem [resolvable:$true] %s30_s22  ;;  %s663_s24 = int_to_ptr.vmem [resolvable:$true] %s51_s24 }
   0x4   :  { %s502_s27 = scalar_lea.hbm %s743_s1, 128 }
   0x5   :  { %p503_p0 = scmp.ne.s32.totalorder %s743_s1, %s502_s27  ;;  %p506_p1 = scmp.lt.u32.totalorder %s502_s27, %s743_s1 }
   0x7   :  { %p508_p2 = pnand %p506_p1, %p503_p0 }
   0x9   :  { %511 = shalt.err (!%p508_p2)
}
   0xa   :  { %s512_s8 = scalar_lea.vmem %s31_s22, 128  ;;  %p517_p4 = scmp.lt.s32.totalorder %s31_s22, %s31_s22 }
   0xb   :  { %p513_p3 = scmp.ne.s32.totalorder %s31_s22, %s512_s8  ;;  %p518_p5 = scmp.lt.s32.totalorder %s512_s8, %s512_s8 }
   0xd   :  { %p519_p6 = por %p518_p5, %p517_p4 }
   0xf   :  { %p520_p7 = pnand %p519_p6, %p513_p3 }
  0x11   :  { %523 = shalt.err (!%p520_p7)
}
  0x12   :  { %33 = dma.hbm_to_vmem [thread:$0]  %s743_s1, 128, %s31_s22, [#allocation5]  }
  0x13   :  { %s524_s13 = scalar_lea.hbm %s746_s4, 2048 }
  0x14   :  { %p525_p8 = scmp.ne.s32.totalorder %s746_s4, %s524_s13  ;;  %p528_p9 = scmp.lt.u32.totalorder %s524_s13, %s746_s4 }
  0x16   :  { %p530_p10 = pnand %p528_p9, %p525_p8 }
  0x18   :  { %533 = shalt.err (!%p530_p10)
}
  0x19   :  { %s534_s18 = scalar_lea.vmem %s663_s24, 2048  ;;  %p539_p12 = scmp.lt.s32.totalorder %s663_s24, %s663_s24 }
  0x1a   :  { %p535_p11 = scmp.ne.s32.totalorder %s663_s24, %s534_s18  ;;  %p540_p13 = scmp.lt.s32.totalorder %s534_s18, %s534_s18 }
  0x1c   :  { %p541_p0 = por %p540_p13, %p539_p12 }
  0x1e   :  { %p542_p1 = pnand %p541_p0, %p535_p11 }
  0x20   :  { %545 = shalt.err (!%p542_p1)
}
  0x21   :  { %s620_s1 = smov 128   ;;  %s621_s19 = smov 8  }
  0x22   :  { %57 = dma.hbm_to_vmem [thread:$0]  %s746_s4, 2048, %s663_s24, [#allocation8], %s620_s1, %s620_s1, %s621_s19  }
  0x23   :  { %s622_s22 = smov [#allocation2]   ;;  %s623_s25 = smov [#allocation6]  }
  0x24   :  { %s20_s23 = sshll.u32 %s622_s22, 4  ;;  %s42_s26 = sshll.u32 %s623_s25, 4  ;;  %s21_s23 = int_to_ptr.vmem [resolvable:$true] %s20_s23  ;;  %s43_s26 = int_to_ptr.vmem [resolvable:$true] %s42_s26 }
  0x25   :  { %s546_s29 = scalar_lea.hbm %s742_s0, 128 }
  0x26   :  { %p547_p2 = scmp.ne.s32.totalorder %s742_s0, %s546_s29  ;;  %p550_p3 = scmp.lt.u32.totalorder %s546_s29, %s742_s0 }
  0x28   :  { %p552_p4 = pnand %p550_p3, %p547_p2 }
  0x2a   :  { %555 = shalt.err (!%p552_p4)
}
  0x2b   :  { %s556_s4 = scalar_lea.vmem %s21_s23, 128  ;;  %p561_p6 = scmp.lt.s32.totalorder %s21_s23, %s21_s23 }
  0x2c   :  { %p557_p5 = scmp.ne.s32.totalorder %s21_s23, %s556_s4  ;;  %p562_p7 = scmp.lt.s32.totalorder %s556_s4, %s556_s4 }
  0x2e   :  { %p563_p8 = por %p562_p7, %p561_p6 }
  0x30   :  { %p564_p9 = pnand %p563_p8, %p557_p5 }
  0x32   :  { %567 = shalt.err (!%p564_p9)
}
  0x33   :  { %23 = dma.hbm_to_vmem [thread:$0]  %s742_s0, 128, %s21_s23, [#allocation3]  }
  0x34   :  { %s568_s13 = scalar_lea.hbm %s745_s3, 128 }
  0x35   :  { %p569_p10 = scmp.ne.s32.totalorder %s745_s3, %s568_s13  ;;  %p572_p11 = scmp.lt.u32.totalorder %s568_s13, %s745_s3 }
  0x37   :  { %p574_p12 = pnand %p572_p11, %p569_p10 }
  0x39   :  { %577 = shalt.err (!%p574_p12)
}
  0x3a   :  { %s578_s18 = scalar_lea.vmem %s43_s26, 128  ;;  %p583_p0 = scmp.lt.s32.totalorder %s43_s26, %s43_s26 }
  0x3b   :  { %p579_p13 = scmp.ne.s32.totalorder %s43_s26, %s578_s18  ;;  %p584_p1 = scmp.lt.s32.totalorder %s578_s18, %s578_s18 }
  0x3d   :  { %p585_p2 = por %p584_p1, %p583_p0 }
  0x3f   :  { %p586_p3 = pnand %p585_p2, %p579_p13 }
  0x41   :  { %589 = shalt.err (!%p586_p3)
}
  0x42   :  { %45 = dma.hbm_to_vmem [thread:$0]  %s745_s3, 128, %s43_s26, [#allocation5]  }
  0x43   :  { %s624_s19 = smov [#allocation9]   ;;  %s590_s23 = scalar_lea.hbm %s747_s5, 128 }
  0x44   :  { %s64_s20 = sshll.u32 %s624_s19, 4  ;;  %p591_p4 = scmp.ne.s32.totalorder %s747_s5, %s590_s23  ;;  %s65_s20 = int_to_ptr.vmem [resolvable:$true] %s64_s20 }
  0x45   :  { %p594_p5 = scmp.lt.u32.totalorder %s590_s23, %s747_s5 }
  0x47   :  { %p596_p6 = pnand %p594_p5, %p591_p4 }
  0x49   :  { %599 = shalt.err (!%p596_p6)
}
  0x4a   :  { %s600_s30 = scalar_lea.vmem %s65_s20, 128  ;;  %p605_p8 = scmp.lt.s32.totalorder %s65_s20, %s65_s20 }
  0x4b   :  { %p601_p7 = scmp.ne.s32.totalorder %s65_s20, %s600_s30  ;;  %p606_p9 = scmp.lt.s32.totalorder %s600_s30, %s600_s30 }
  0x4d   :  { %p607_p10 = por %p606_p9, %p605_p8 }
  0x4f   :  { %p608_p11 = pnand %p607_p10, %p601_p7 }
  0x51   :  { %611 = shalt.err (!%p608_p11)
}
  0x52   :  { %67 = dma.hbm_to_vmem [thread:$0]  %s747_s5, 128, %s65_s20, [#allocation8]  }
  0x53   :  { %612 = dma.done.wait [#allocation3], 128  }
  0x54   :  { %613 = vsyncadd [#allocation3], 4294967168 }
  0x55   :  { %614 = dma.done.wait [#allocation5], 256  }
  0x56   :  { %615 = vsyncadd [#allocation5], 4294967040 }
  0x57   :  { %616 = dma.done.wait [#allocation8], 2176  }
  0x58   :  { %617 = vsyncadd [#allocation8], 4294965120  ;;  %v625_v0 = vmov 0.0   ;;  %vm626_vm0 = vmmov 0   ;;  %v627_v1 = vmov 0.0|0.0   ;;  %vm89_vm1 = vcmask 64512  }
  0x59   :  { %416 = vmatprep.subr.mxu1 %v625_v0  ;;  %418 = vmatprep.mubr.msk.f32.mxu1 %vm626_vm0, %v625_v0  ;;  %v88_v2 = vld [vmem:[#allocation6] sm:$0xff]  ;;  %v87_v3 = vld [vmem:[#allocation4] sm:$0xff]  ;;  %v86_v5 = vld [vmem:[%s744_s2 + $0x8] sm:$0xff]  ;;  %vm163_vm2 = vcmask 130048   ;;  %v237_v32 = vlaneseq  ;;  %vm366_vm3 = vcmask 1043459   ;;  %vm383_vm4 = vcmask 7168  }
  0x5a   :  { %466 = vmatprep.subr.bf16.mxu0 %v627_v1  ;;  %460 = vmatprep.mubr.msk.f32.mxu0 %vm626_vm0, %v625_v0  ;;  %v85_v4 = vld [vmem:[%s744_s2] sm:$0xff]  ;;  %v243_v6 = vld [vmem:[#allocation7] sm:$0xff]  ;;  %v244_v8 = vld [vmem:[#allocation7 + $0x8] sm:$0xff] }
  0x5b   :  { %417 = vmatpush3.msra.mxu1 %v88_v2  ;;  %v464_v7 = vpack.c.bf16 %v86_v5, %v85_v4  ;;  %v245_v9 = vld [vmem:[#allocation7 + $0x10] sm:$0xff]  ;;  %v246_v10 = vld [vmem:[#allocation7 + $0x18] sm:$0xff]  ;;  %v467_v11 = vpack.c.bf16 %v244_v8, %v243_v6  ;;  %v84_v12 = vld [vmem:[#allocation2] sm:$0xff]  ;;  %v238_v33 = vshrl.u32 %v237_v32, 7 }
  0x5c   :  { %419 = vmatmul.mubr.msk.f32.vlgmr.msra.gmra.mrb[0].mxu1 %vm89_vm1, %v87_v3  ;;  %463 = vmatprep.subr.bf16.mxu1 %v627_v1  ;;  %v470_v13 = vpack.c.bf16 %v246_v10, %v245_v9  ;;  %v247_v14 = vld [vmem:[#allocation7 + $0x20] sm:$0xff]  ;;  %v248_v15 = vld [vmem:[#allocation7 + $0x28] sm:$0xff]  ;;  %v249_v17 = vld [vmem:[#allocation7 + $0x30] sm:$0xff] }
  0x5d   :  { %425 = vmatprep.mubr.msk.f32.mxu1 %vm626_vm0, %v625_v0  ;;  %465 = vmatpush3.bf16.msra.mxu1 %v464_v7  ;;  %v473_v16 = vpack.c.bf16 %v248_v15, %v247_v14  ;;  %v250_v18 = vld [vmem:[#allocation7 + $0x38] sm:$0xff]  ;;  %v251_v20 = vld [vmem:[#allocation7 + $0x40] sm:$0xff]  ;;  %v252_v21 = vld [vmem:[#allocation7 + $0x48] sm:$0xff]  ;;  %v239_v35 = vsub.s32 0, %v238_v33  ;;  %v261_v44 = vsub.s32 1, %v238_v33 }
  0x5e   :  { %468 = vmatpush3.bf16.msra.mxu0 %v467_v11  ;;  %v476_v19 = vpack.c.bf16 %v250_v18, %v249_v17  ;;  %v479_v22 = vpack.c.bf16 %v252_v21, %v251_v20  ;;  %v253_v23 = vld [vmem:[#allocation7 + $0x50] sm:$0xff]  ;;  %v254_v24 = vld [vmem:[#allocation7 + $0x58] sm:$0xff]  ;;  %v255_v26 = vld [vmem:[#allocation7 + $0x60] sm:$0xff]  ;;  %v373_v11 = vsub.s32 2, %v238_v33  ;;  %v380_v17 = vsub.s32 3, %v238_v33 }
  0x5f   :  { %469 = vmatprep.subr.bf16.mxu0 %v627_v1  ;;  %v482_v25 = vpack.c.bf16 %v254_v24, %v253_v23  ;;  %v256_v27 = vld [vmem:[#allocation7 + $0x68] sm:$0xff]  ;;  %v257_v29 = vld [vmem:[#allocation7 + $0x70] sm:$0xff]  ;;  %v258_v30 = vld [vmem:[#allocation7 + $0x78] sm:$0xff] }
  0x60   :  { %426 = vmatmul.mubr.msk.f32.vlgmr.msra.gmra.mrb[2].mxu1 %vm163_vm2, %v84_v12  ;;  %v485_v28 = vpack.c.bf16 %v256_v27, %v255_v26  ;;  %v488_v31 = vpack.c.bf16 %v258_v30, %v257_v29  ;;  %v83_v37 = vld [vmem:[#allocation9] sm:$0xff] }
  0x61   :  { %v240_v38 = vrot.slane %v83_v37, %v239_v35  ;;  %v262_v45 = vrot.slane %v83_v37, %v261_v44  ;;  %v360_v6 = vrot.slane %v83_v37, 2  ;;  %v363_v9 = vrot.slane %v83_v37, 1 }
  0x62   :  { %471 = vmatpush3.bf16.msra.mxu0 %v470_v13 }
  0x63   :  { %472 = vmatprep.subr.bf16.mxu0 %v627_v1 }
  0x66   :  { %474 = vmatpush3.bf16.msra.mxu0 %v473_v16 }
  0x67   :  { %475 = vmatprep.subr.bf16.mxu0 %v627_v1 }
  0x6a   :  { %477 = vmatpush3.bf16.msra.mxu0 %v476_v19 }
  0x6b   :  { %478 = vmatprep.subr.bf16.mxu0 %v627_v1 }
  0x6e   :  { %480 = vmatpush3.bf16.msra.mxu0 %v479_v22 }
  0x6f   :  { %481 = vmatprep.subr.bf16.mxu0 %v627_v1 }
  0x72   :  { %483 = vmatpush3.bf16.msra.mxu0 %v482_v25 }
  0x73   :  { %484 = vmatprep.subr.bf16.mxu0 %v627_v1 }
  0x76   :  { %486 = vmatpush3.bf16.msra.mxu0 %v485_v28 }
  0x77   :  { %487 = vmatprep.subr.bf16.mxu0 %v627_v1 }
  0x7a   :  { %489 = vmatpush3.bf16.msra.mxu0 %v488_v31 }
 0x12f   :  { %v159_v34 = vpop.f32.mrb[0].mxu1 }
 0x130   :  { %v420_v36 = vpop.f32.mrb[1].mxu1 }
 0x133   :  { %v233_v39 = vpop.f32.mrb[2].mxu1 }
 0x134   :  { %v234_v40 = vadd.f32 %v233_v39, %v159_v34  ;;  %v427_v41 = vpop.f32.mrb[3].mxu1 }
 0x136   :  { %v241_v42 = vadd.f32 %v240_v38, %v234_v40 }
 0x138   :  { %v242_v43 = vmax.f32 %v241_v42, 0.0 }
 0x13a   :  { %461 = vmatmul.mubr.f32.vlgmr.msra.gmra.mrb[0].mxu0 %v242_v43 }
 0x20d   :  { %v329_v46 = vpop.f32.mrb[0].mxu0 }
 0x20e   :  { %v330_v47 = vadd.f32 %v329_v46, %v262_v45  ;;  %v462_v48 = vpop.f32.mrb[1].mxu0 }
 0x210   :  { %v333_v49 = vrot.slane %v330_v47, 4  ;;  %v339_v50 = vmul.f32 %v330_v47, %v330_v47 }
 0x212   :  { %v334_v51 = vadd.f32 %v333_v49, %v330_v47  ;;  %v340_v52 = vrot.slane %v339_v50, 4 }
 0x214   :  { %v335_v53 = vrot.slane %v334_v51, 2  ;;  %v341_v54 = vadd.f32 %v340_v52, %v339_v50 }
 0x216   :  { %v336_v55 = vadd.f32 %v335_v53, %v334_v51  ;;  %v342_v56 = vrot.slane %v341_v54, 2 }
 0x218   :  { %v343_v57 = vadd.f32 %v342_v56, %v341_v54  ;;  %v337_v58 = vrot.slane %v336_v55, 1 }
 0x21a   :  { %v344_v59 = vrot.slane %v343_v57, 1  ;;  %v338_v60 = vadd.f32 %v337_v58, %v336_v55 }
 0x21c   :  { %v345_v61 = vadd.f32 %v344_v59, %v343_v57  ;;  %v346_v62 = vmul.f32 0.125, %v338_v60 }
 0x21e   :  { %v347_v63 = vmul.f32 0.125, %v345_v61  ;;  %v348_v0 = vmul.f32 %v346_v62, %v346_v62 }
 0x220   :  { %v349_v1 = vsub.f32 %v347_v63, %v348_v0 }
 0x222   :  { %v350_v2 = vmax.f32 %v349_v1, 0.0 }
 0x224   :  { %v351_v3 = vadd.f32 1e-05, %v350_v2 }
 0x226   :  { %500 = vrsqrt.f32 %v351_v3 }
 0x230   :  { %v501_v4 = vpop.eup %500 }
 0x231   :  { %v353_v5 = vmul.f32 %v501_v4, %v83_v37 }
 0x233   :  { %v354_v7 = vmul.f32 %v353_v5, %v346_v62  ;;  %v362_v10 = vmul.f32 %v360_v6, %v353_v5 }
 0x235   :  { %v356_v8 = vrot.slane %v354_v7, 7  ;;  %v374_v14 = vrot.slane %v362_v10, %v373_v11 }
 0x237   :  { %v358_v12 = vsub.f32 %v83_v37, %v356_v8  ;;  %v375_v16 = vmul.f32 %v374_v14, %v330_v47 }
 0x239   :  { %v365_v13 = vmul.f32 %v363_v9, %v358_v12 }
 0x23b   :  { %v367_v15 = vsel %vm366_vm3, %v365_v13, 0.0 }
 0x23c   :  { %368 = vadd.xlane.f32.xlu0 %v367_v15 }
 0x240   :  { %376 = vadd.xlane.f32.xlu0 %v375_v16 }
 0x2c9   :  { %v369_v18 = vpop.xlane.xlu0 %368 }
 0x2ca   :  { %v370_v19 = vadd.f32 %v369_v18, %v360_v6 }
 0x2cc   :  { %v381_v20 = vrot.slane %v370_v19, %v380_v17 }
 0x2cd   :  { %v377_v21 = vpop.xlane.xlu0 %376 }
 0x2ce   :  { %v382_v22 = vadd.f32 %v381_v20, %v377_v21 }
 0x2d0   :  { %384 = vst.msk [vmem:[%s748_s6] sm:$0xff] %vm383_vm4, %v382_v22 }
 0x2d1   :  { %389 = vsyncpa [#allocation3], 1 }
 0x2d2   :  { %390 = vsyncpa [#allocation5], 1 }
 0x2d3   :  { %391 = vsyncpa [#allocation8], 1 }

</bundles_post_ra>
